<compile_context>
chip_gen: v5e
topology: v5e:2x2
jax: 0.10.0
libtpu: 0.0.40
codegen_flags: <defaults>
</compile_context>

<pallas_src>
import functools
import numpy as np
import jax
import jax.numpy as jnp
from jax.experimental import pallas as pl
from jax.experimental.pallas import tpu as pltpu

_HIGHEST = jax.lax.Precision.HIGHEST


# ----------------------------- fused Pallas kernel --------------------------

def _make_fused_kernel(n_streams, d3_ranges, has_d3):
    """Build the fused forward kernel for a host-static routing configuration.

    Ref order:
      inputs : (x_s, w_s, b_s) for each stream, then (wl, bl) if has_d3
      outputs: one activation slab per stream, then the d3 slab if has_d3

    d3_ranges: tuple of (stream_idx, src_off, size, dst_off) — host-static and
    contiguous per participant, so the "gather" is just static slices/stores.
    All intermediates stay in VMEM/vregs; one kernel launch for the whole pass.
    """
    def kernel(*refs):
        n_in = 3 * n_streams + (2 if has_d3 else 0)
        in_refs, out_refs = refs[:n_in], refs[n_in:]
        if has_d3:
            wl_ref = in_refs[3 * n_streams]
            bl_ref = in_refs[3 * n_streams + 1]
            d3_ref = out_refs[n_streams]
        slabs = []
        for s in range(n_streams):
            x_ref, w_ref, b_ref = in_refs[3 * s: 3 * s + 3]
            v = (jnp.dot(x_ref[...], w_ref[...],
                         preferred_element_type=jnp.float32) + b_ref[...])
            out_refs[s][...] = v.astype(out_refs[s].dtype)
            slabs.append(v)
        if has_d3:
            for (s, src_off, size, dst_off) in d3_ranges:
                blk = slabs[s][src_off:src_off + size]          # static slice
                d3_ref[dst_off:dst_off + size, :] = (
                    jnp.dot(blk, wl_ref[...],
                            preferred_element_type=jnp.float32)
                    + bl_ref[...]).astype(d3_ref.dtype)
    return kernel


def _fused_forward_call(streams, x_width, wl, bl, d3_ranges, n3,
                        dtype=jnp.float32):
    """One pallas_call: every operand/result is a whole-array VMEM block."""
    has_d3 = n3 > 0
    inputs = []
    for (x, w, b) in streams:
        inputs += [x, w, b]
    if has_d3:
        inputs += [wl, bl]

    out_shape = tuple(jax.ShapeDtypeStruct((int(x.shape[0]), x_width), dtype)
                      for (x, _, _) in streams)
    if has_d3:
        out_shape += (jax.ShapeDtypeStruct((n3, int(wl.shape[1])), dtype),)

    vmem = pl.BlockSpec(memory_space=pltpu.MemorySpace.VMEM)
    kernel = _make_fused_kernel(len(streams), tuple(d3_ranges), has_d3)
    return pl.pallas_call(
        kernel,
        out_shape=out_shape,
        in_specs=[vmem] * len(inputs),
        out_specs=tuple([vmem] * len(out_shape)),
    )(*inputs)


# --------------------------- parameter creation -----------------------------

def make_linear_params(key, in_dim, out_dim, dtype=jnp.float32):
    """Deterministic init mimicking nn.Linear.reset_parameters (arrays only)."""
    kw, kb = jax.random.split(key)
    bound = 1.0 / np.sqrt(in_dim)
    w = jax.random.uniform(kw, (out_dim, in_dim), dtype, -bound, bound)  # torch layout
    b = jax.random.uniform(kb, (out_dim,), dtype, -bound, bound)
    return {"w_t": jnp.asarray(w.T),        # [in, out]; kernel does y = x @ W_t + b
            "b": jnp.asarray(b[None, :])}   # [1, out]


# --------------------------- ServerDisc.forward -----------------------------

@functools.partial(jax.jit, static_argnums=(3, 4, 5, 6, 7))
def server_disc_forward(layers, x0, x1, d1_participants, d2_participants,
                        d3_participants, batch_sizes, cluster=False):
    """ServerDisc.forward: one fused Pallas kernel + jit-fused static slicing."""
    all_d = list(d1_participants) + list(d2_participants)
    sizes = [int(batch_sizes[c]) for c in all_d]
    offs = np.cumsum([0] + sizes).tolist()
    ntot = offs[-1]

    n0, n1 = int(x0.shape[0]), int(x1.shape[0])
    assert ntot == n0 + n1, "batch_sizes must match x0/x1 row counts"

    l0_w, l0_b = layers[0]["w_t"], layers[0]["b"]
    l1_w, l1_b = layers[1]["w_t"], layers[1]["b"]
    wl, bl = layers[-1]["w_t"], layers[-1]["b"]
    d3_width = int(wl.shape[1])

    # Streams: independent (activation, weight, bias) row blocks.  The
    # torch.cat along the batch axis is just "two streams, two contiguous
    # output slabs" — no placement matmuls, no in-kernel concat.
    if n0 > 0:
        # Fold layer0 into layer1 on the x0 path (trace time, exact algebra):
        # layer1(layer0(x)) == x @ (W0 W1) + (b0 W1 + b1).
        w01 = jnp.dot(l0_w, l1_w, precision=_HIGHEST)
        b01 = jnp.dot(l0_b, l1_w, precision=_HIGHEST) + l1_b
    if n0 > 0 and n1 > 0:
        streams = [(x0, w01, b01), (x1, l1_w, l1_b)]
        bounds = [0, n0, ntot]
        x_width = int(l1_w.shape[1])
    elif n0 > 0:                      # x1 empty: x = layer1(layer0(x0))
        streams = [(x0, w01, b01)]
        bounds = [0, ntot]
        x_width = int(l1_w.shape[1])
    elif n1 > 0:                      # x0 empty: x = layer0(x1)
        streams = [(x1, l0_w, l0_b)]
        bounds = [0, ntot]
        x_width = int(l0_w.shape[1])
    else:                             # fully empty forward
        streams, bounds, x_width = [], [0, 0], int(l0_w.shape[1])

    # d3 routing: contiguous host-static ranges (no one-hot gather matrix).
    d3_idx = [c for c in all_d if c in d3_participants]
    sizes3 = [int(batch_sizes[c]) for c in d3_idx]
    offs3 = np.cumsum([0] + sizes3).tolist()
    n3 = offs3[-1]

    def locate(a, b):
        for s in range(len(bounds) - 1):
            if a >= bounds[s] and b <= bounds[s + 1]:
                return s, a - bounds[s], b - bounds[s]
        raise ValueError("participant range straddles the x0/x1 boundary")

    d3_ranges, j = [], 0
    for i, c in enumerate(all_d):
        if c in d3_participants:
            a, b = offs[i], offs[i + 1]
            if b > a:
                s, la, lb = locate(a, b)
                d3_ranges.append((s, la, lb - la, offs3[j]))
            j += 1

    # ---- one fused pallas_call for the whole forward ----
    if streams:
        outs = _fused_forward_call(streams, x_width, wl, bl, d3_ranges, n3)
        slabs = list(outs[:len(streams)])
        d3_slab = outs[len(streams)] if n3 > 0 else None
    else:
        slabs, d3_slab = [], None

    # Per-participant outputs: static slices of the contiguous slabs; under
    # jit these fuse into the program (no eager per-chunk dispatch).
    def x_chunk(i):
        a, b = offs[i], offs[i + 1]
        if b == a or not slabs:
            return jnp.zeros((0, x_width), jnp.float32)
        s, la, lb = locate(a, b)
        return slabs[s][la:lb]

    chunks_d2 = [x_chunk(i) for i in range(len(all_d))]

    server_outputs = [None] * len(all_d)
    j = 0
    for i, c in enumerate(all_d):
        if c in d3_participants:
            if d3_slab is not None and offs3[j + 1] > offs3[j]:
                server_outputs[c] = d3_slab[offs3[j]:offs3[j + 1]]
            else:
                server_outputs[c] = jnp.zeros((0, d3_width), jnp.float32)
            j += 1
        else:
            server_outputs[c] = chunks_d2[i]

    if cluster:
        return server_outputs, list(all_d), chunks_d2
    return server_outputs


# ---------------------------- pure-JAX reference ----------------------------

def _linear_ref(p, x):
    return jnp.dot(x, p["w_t"], precision=_HIGHEST) + p["b"]


def server_disc_forward_ref(layers, x0, x1, d1_participants, d2_participants,
                            d3_participants, batch_sizes):
    all_d = list(d1_participants) + list(d2_participants)
    server_outputs = [None] * len(all_d)
    if x0.shape[0] > 0:
        x0o = _linear_ref(layers[0], x0)
        x = _linear_ref(layers[1], jnp.concatenate([x0o, x1], axis=0))
    else:
        x = _linear_ref(layers[0], x1)
    sizes = np.array(batch_sizes)[np.array(all_d)].tolist()
    offs = np.cumsum([0] + sizes)
    chunks_d2 = [x[offs[i]:offs[i + 1]] for i in range(len(all_d))]
    d3_input, d3_idx = [], []
    for i, c in enumerate(all_d):
        if c not in d3_participants:
            server_outputs[c] = chunks_d2[i]
        else:
            d3_input.append(chunks_d2[i])
            d3_idx.append(c)
    if d3_input:
        d3_out = _linear_ref(layers[-1], jnp.concatenate(d3_input, axis=0))
        sizes3 = np.array(batch_sizes)[np.array(d3_idx)].tolist()
        offs3 = np.cumsum([0] + sizes3)
        for i, c in enumerate(d3_idx):
            server_outputs[c] = d3_out[offs3[i]:offs3[i + 1]]
    return server_outputs


# ---------------------------------- main ------------------------------------

if __name__ == "__main__":
    key = jax.random.PRNGKey(0)
    k0, k1, k2, kx0, kx1 = jax.random.split(key, 5)

    HIDDEN, OUT = 32, 16

    # "add_layer" equivalents (deterministic synthetic init).
    layers = [
        make_linear_params(k0, HIDDEN, HIDDEN),
        make_linear_params(k1, HIDDEN, HIDDEN),
        make_linear_params(k2, HIDDEN, OUT),
    ]

    # Participant / batch-size bookkeeping (host-static, like the PyTorch code).
    d1_participants = (0, 1)
    d2_participants = (2, 3)
    d3_participants = (1, 3)
    batch_sizes = (2, 3, 2, 1)

    n_x0 = sum(batch_sizes[c] for c in d1_participants)  # 5
    n_x1 = sum(batch_sizes[c] for c in d2_participants)  # 3
    x0 = jax.random.normal(kx0, (n_x0, HIDDEN), jnp.float32)
    x1 = jax.random.normal(kx1, (n_x1, HIDDEN), jnp.float32)

    outs = server_disc_forward(layers, x0, x1, d1_participants,
                               d2_participants, d3_participants,
                               batch_sizes, False)
    outs = jax.block_until_ready(outs)

    # Correctness check against a pure-JAX reference of the same forward.
    ref = server_disc_forward_ref(layers, x0, x1, list(d1_participants),
                                  list(d2_participants), list(d3_participants),
                                  list(batch_sizes))
    for o, r in zip(outs, ref):
        np.testing.assert_allclose(np.asarray(o), np.asarray(r),
                                   rtol=1e-4, atol=1e-5)

    print("KERNEL_OK")
</pallas_src>

<mosaic_0001>
module attributes {stable_mosaic.version = 11 : i64} {
  func.func @kernel(%arg0: memref<5x32xf32, #tpu.memory_space<vmem>>, %arg1: memref<32x32xf32, #tpu.memory_space<vmem>>, %arg2: memref<1x32xf32, #tpu.memory_space<vmem>>, %arg3: memref<3x32xf32, #tpu.memory_space<vmem>>, %arg4: memref<32x32xf32, #tpu.memory_space<vmem>>, %arg5: memref<1x32xf32, #tpu.memory_space<vmem>>, %arg6: memref<32x16xf32, #tpu.memory_space<vmem>>, %arg7: memref<1x16xf32, #tpu.memory_space<vmem>>, %arg8: memref<5x32xf32, #tpu.memory_space<vmem>>, %arg9: memref<3x32xf32, #tpu.memory_space<vmem>>, %arg10: memref<4x16xf32, #tpu.memory_space<vmem>>) attributes {dimension_semantics = [], scalar_prefetch = 0 : i64, scratch_operands = 0 : i64, tpu.core_type = #tpu.core_type<tc>} {
    %c0 = arith.constant 0 : index
    %c0_0 = arith.constant 0 : index
    %0 = vector.load %arg0[%c0, %c0_0] : memref<5x32xf32, #tpu.memory_space<vmem>>, vector<5x32xf32>
    %c0_1 = arith.constant 0 : index
    %c0_2 = arith.constant 0 : index
    %1 = vector.load %arg1[%c0_1, %c0_2] : memref<32x32xf32, #tpu.memory_space<vmem>>, vector<32x32xf32>
    %cst = arith.constant dense<0.000000e+00> : vector<5x32xf32>
    %2 = tpu.matmul %0, %1, %cst {dimension_numbers = #tpu.dot_dimension_numbers<[1], [0], [0], [1], [0, 0, 1, 1], [], []>} : vector<5x32xf32>, vector<32x32xf32>, vector<5x32xf32> -> vector<5x32xf32>
    %c0_3 = arith.constant 0 : index
    %c0_4 = arith.constant 0 : index
    %3 = vector.load %arg2[%c0_3, %c0_4] : memref<1x32xf32, #tpu.memory_space<vmem>>, vector<1x32xf32>
    %4 = vector.broadcast %3 : vector<1x32xf32> to vector<5x32xf32>
    %5 = arith.addf %2, %4 : vector<5x32xf32>
    %c0_5 = arith.constant 0 : index
    %c0_6 = arith.constant 0 : index
    %6 = vector.load %arg8[%c0_5, %c0_6] : memref<5x32xf32, #tpu.memory_space<vmem>>, vector<5x32xf32>
    tpu.vector_store %arg8[%c0_5, %c0_6], %5 {strides = array<i32>} : memref<5x32xf32, #tpu.memory_space<vmem>>, vector<5x32xf32>,
    %c0_7 = arith.constant 0 : index
    %c0_8 = arith.constant 0 : index
    %7 = vector.load %arg3[%c0_7, %c0_8] : memref<3x32xf32, #tpu.memory_space<vmem>>, vector<3x32xf32>
    %c0_9 = arith.constant 0 : index
    %c0_10 = arith.constant 0 : index
    %8 = vector.load %arg4[%c0_9, %c0_10] : memref<32x32xf32, #tpu.memory_space<vmem>>, vector<32x32xf32>
    %cst_11 = arith.constant dense<0.000000e+00> : vector<3x32xf32>
    %9 = tpu.matmul %7, %8, %cst_11 {dimension_numbers = #tpu.dot_dimension_numbers<[1], [0], [0], [1], [0, 0, 1, 1], [], []>} : vector<3x32xf32>, vector<32x32xf32>, vector<3x32xf32> -> vector<3x32xf32>
    %c0_12 = arith.constant 0 : index
    %c0_13 = arith.constant 0 : index
    %10 = vector.load %arg5[%c0_12, %c0_13] : memref<1x32xf32, #tpu.memory_space<vmem>>, vector<1x32xf32>
    %11 = vector.broadcast %10 : vector<1x32xf32> to vector<3x32xf32>
    %12 = arith.addf %9, %11 : vector<3x32xf32>
    %c0_14 = arith.constant 0 : index
    %c0_15 = arith.constant 0 : index
    %13 = vector.load %arg9[%c0_14, %c0_15] : memref<3x32xf32, #tpu.memory_space<vmem>>, vector<3x32xf32>
    tpu.vector_store %arg9[%c0_14, %c0_15], %12 {strides = array<i32>} : memref<3x32xf32, #tpu.memory_space<vmem>>, vector<3x32xf32>,
    %14 = vector.extract_strided_slice %5 {offsets = [2, 0], sizes = [3, 32], strides = [1, 1]} : vector<5x32xf32> to vector<3x32xf32>
    %c0_16 = arith.constant 0 : index
    %c0_17 = arith.constant 0 : index
    %15 = vector.load %arg6[%c0_16, %c0_17] : memref<32x16xf32, #tpu.memory_space<vmem>>, vector<32x16xf32>
    %cst_18 = arith.constant dense<0.000000e+00> : vector<3x16xf32>
    %16 = tpu.matmul %14, %15, %cst_18 {dimension_numbers = #tpu.dot_dimension_numbers<[1], [0], [0], [1], [0, 0, 1, 1], [], []>} : vector<3x32xf32>, vector<32x16xf32>, vector<3x16xf32> -> vector<3x16xf32>
    %c0_19 = arith.constant 0 : index
    %c0_20 = arith.constant 0 : index
    %17 = vector.load %arg7[%c0_19, %c0_20] : memref<1x16xf32, #tpu.memory_space<vmem>>, vector<1x16xf32>
    %18 = vector.broadcast %17 : vector<1x16xf32> to vector<3x16xf32>
    %19 = arith.addf %16, %18 : vector<3x16xf32>
    %c0_21 = arith.constant 0 : index
    %c0_22 = arith.constant 0 : index
    %20 = vector.load %arg10[%c0_21, %c0_22] : memref<4x16xf32, #tpu.memory_space<vmem>>, vector<3x16xf32>
    tpu.vector_store %arg10[%c0_21, %c0_22], %19 {strides = array<i32>} : memref<4x16xf32, #tpu.memory_space<vmem>>, vector<3x16xf32>,
    %21 = vector.extract_strided_slice %12 {offsets = [2, 0], sizes = [1, 32], strides = [1, 1]} : vector<3x32xf32> to vector<1x32xf32>
    %c0_23 = arith.constant 0 : index
    %c0_24 = arith.constant 0 : index
    %22 = vector.load %arg6[%c0_23, %c0_24] : memref<32x16xf32, #tpu.memory_space<vmem>>, vector<32x16xf32>
    %cst_25 = arith.constant dense<0.000000e+00> : vector<1x16xf32>
    %23 = tpu.matmul %21, %22, %cst_25 {dimension_numbers = #tpu.dot_dimension_numbers<[1], [0], [0], [1], [0, 0, 1, 1], [], []>} : vector<1x32xf32>, vector<32x16xf32>, vector<1x16xf32> -> vector<1x16xf32>
    %c0_26 = arith.constant 0 : index
    %c0_27 = arith.constant 0 : index
    %24 = vector.load %arg7[%c0_26, %c0_27] : memref<1x16xf32, #tpu.memory_space<vmem>>, vector<1x16xf32>
    %25 = arith.addf %23, %24 : vector<1x16xf32>
    %c3 = arith.constant 3 : index
    %c0_28 = arith.constant 0 : index
    %26 = vector.load %arg10[%c3, %c0_28] : memref<4x16xf32, #tpu.memory_space<vmem>>, vector<1x16xf32>
    tpu.vector_store %arg10[%c3, %c0_28], %25 {strides = array<i32>} : memref<4x16xf32, #tpu.memory_space<vmem>>, vector<1x16xf32>,
    return
  }
}

</mosaic_0001>

<bundles_post_ra>
// kernel: server_disc_forward.1
= control target key start
LH: loop header
LB: loop body
LE: loop exit
PB: predicated region body
PF: predicated region fallthrough
CT: control target
= control target key end

     0   :  { %vm41_vm0 = vcmask 261120   ;;  %vm65_vm1 = vcmask 258048   ;;  %vm99_vm2 = vcmask 256000   ;;  %vm133_vm3 = vcmask 124928   ;;  %s310_s1 = inlined_call_operand.vmem [shape: f32[32,32], index: 1, kind: input, shape index: {}]   ;;  %s311_s4 = inlined_call_operand.vmem [shape: f32[32,32], index: 4, kind: input, shape index: {}]   ;;  %s312_s6 = inlined_call_operand.vmem [shape: f32[32,16], index: 6, kind: input, shape index: {}]   ;;  %s313_s0 = inlined_call_operand.vmem [shape: f32[5,32], index: 0, kind: input, shape index: {}]   ;;  %s314_s3 = inlined_call_operand.vmem [shape: f32[3,32], index: 3, kind: input, shape index: {}]   ;;  %s315_s2 = inlined_call_operand.vmem [shape: f32[1,32], index: 2, kind: input, shape index: {}]   ;;  %s316_s5 = inlined_call_operand.vmem [shape: f32[1,32], index: 5, kind: input, shape index: {}]   ;;  %s317_s7 = inlined_call_operand.vmem [shape: f32[1,16], index: 7, kind: input, shape index: {}]   ;;  %s318_s8 = inlined_call_operand.vmem [shape: f32[5,32], index: 8, kind: output, shape index: {0}]   ;;  %s319_s9 = inlined_call_operand.vmem [shape: f32[3,32], index: 9, kind: output, shape index: {1}]   ;;  %s320_s10 = inlined_call_operand.vmem [shape: f32[4,16], index: 10, kind: output, shape index: {2}]  }
   0x1   :  { %v36_v0 = vld [vmem:[%s310_s1 + $0x18] sm:$0xff]  ;;  %v35_v2 = vld [vmem:[%s310_s1 + $0x10] sm:$0xff]  ;;  %v34_v4 = vld [vmem:[%s310_s1 + $0x8] sm:$0xff]  ;;  %vm164_vm4 = vcmask 122880  }
   0x2   :  { %v71_v1 = vld [vmem:[%s311_s4 + $0x18] sm:$0xff]  ;;  %57 = vmatpush.msra.mxu0 %v36_v0  ;;  %v70_v3 = vld [vmem:[%s311_s4 + $0x10] sm:$0xff]  ;;  %v69_v5 = vld [vmem:[%s311_s4 + $0x8] sm:$0xff] }
   0x3   :  { %91 = vmatpush.msra.mxu1 %v71_v1  ;;  %v104_v6 = vld [vmem:[%s312_s6 + $0x18] sm:$0xff]  ;;  %v33_v7 = vld [vmem:[%s310_s1] sm:$0xff]  ;;  %v103_v11 = vld [vmem:[%s312_s6 + $0x10] sm:$0xff] }
   0x4   :  { %58 = vmatpush.msra.mxu0 %v35_v2  ;;  %v68_v8 = vld [vmem:[%s311_s4] sm:$0xff]  ;;  %125 = vmatpush.msra.mxu2 %v104_v6  ;;  %v102_v12 = vld [vmem:[%s312_s6 + $0x8] sm:$0xff] }
   0x5   :  { %92 = vmatpush.msra.mxu1 %v70_v3  ;;  %156 = vmatpush.msra.mxu3 %v104_v6  ;;  %v32_v9 = vld [vmem:[%s313_s0] sm:$0x1f] }
   0x6   :  { %59 = vmatpush.msra.mxu0 %v34_v4  ;;  %v67_v10 = vld [vmem:[%s314_s3] sm:$0x7]  ;;  %126 = vmatpush.msra.mxu2 %v103_v11 }
   0x7   :  { %93 = vmatpush.msra.mxu1 %v69_v5  ;;  %157 = vmatpush.msra.mxu3 %v103_v11  ;;  %v101_v13 = vld [vmem:[%s312_s6] sm:$0xff] }
   0x8   :  { %60 = vmatpush.msra.mxu0 %v33_v7  ;;  %127 = vmatpush.msra.mxu2 %v102_v12  ;;  %v182_v14 = vld [vmem:[%s315_s2] ss:$0 sm:$0xff] }
   0x9   :  { %94 = vmatpush.msra.mxu1 %v68_v8  ;;  %178 = vmatmul.msk.f32.vlgmr.msra.gmra.mxu0 %vm41_vm0, %v32_v9  ;;  %v183_v15 = vld [vmem:[%s316_s5] ss:$0 sm:$0xff] }
   0xa   :  { %179 = vmatmul.msk.f32.vlgmr.msra.gmra.mxu1 %vm41_vm0, %v67_v10  ;;  %158 = vmatpush.msra.mxu3 %v102_v12  ;;  %v184_v22 = vld [vmem:[%s317_s7] ss:$0 sm:$0xff] }
   0xb   :  { %128 = vmatpush.msra.mxu2 %v101_v13  ;;  %v139_v23 = vld [vmem:[%s317_s7] sm:$0x1] }
   0xc   :  { %159 = vmatpush.msra.mxu3 %v101_v13 }
  0x86   :  { %v62_v16 = vpop.f32.mrf.mxu0 }
  0x87   :  { %v96_v17 = vpop.f32.mrf.mxu1  ;;  %v63_v18 = vadd.f32 %v182_v14, %v62_v16 }
  0x88   :  { %v97_v19 = vadd.f32 %v183_v15, %v96_v17 }
  0x89   :  { %66 = vst.msk [vmem:[%s318_s8] sm:$0x1f] %vm65_vm1, %v63_v18  ;;  %v110_v20 = vrot.slane %v63_v18, 2 }
  0x8a   :  { %v141_v21 = vrot.slane %v97_v19, 2  ;;  %100 = vst.msk [vmem:[%s319_s9] sm:$0x7] %vm99_vm2, %v97_v19 }
  0x8b   :  { %180 = vmatmul.msk.f32.vlgmr.msra.gmra.mxu2 %vm41_vm0, %v110_v20 }
  0x8c   :  { %181 = vmatmul.msk.f32.vlgmr.msra.gmra.mxu3 %vm41_vm0, %v141_v21 }
 0x10e   :  { %v130_v24 = vpop.f32.mrf.mxu2 }
 0x10f   :  { %v161_v25 = vpop.f32.mrf.mxu3  ;;  %v131_v26 = vadd.f32 %v184_v22, %v130_v24 }
 0x110   :  { %v162_v27 = vadd.f32 %v161_v25, %v139_v23 }
 0x111   :  { %134 = vst.msk [vmem:[%s320_s10] sm:$0x7] %vm133_vm3, %v131_v26 }
 0x112   :  { %165 = vst.msk [vmem:[%s320_s10 + $0x3] sm:$0x1] %vm164_vm4, %v162_v27 }

</bundles_post_ra>
